<compile_context>
chip_gen: v7x
topology: tpu7x:2x2x1
jax: 0.10.0
libtpu: 0.0.40
codegen_flags: <defaults>
</compile_context>

<pallas_src>
import functools

import jax
import jax.numpy as jnp
from jax.experimental import pallas as pl
from jax.experimental.pallas import tpu as pltpu


def _round_up(x, m):
    return (x + m - 1) // m * m


def _detect_vmem_capacity():
    """Per-core VMEM bytes; conservative 64 MiB fallback if the query fails."""
    try:
        info = pltpu.get_tpu_info()
        cap = getattr(info, "vmem_capacity_bytes", None)
        if cap:
            return int(cap)
    except Exception:
        pass
    return 64 << 20


_VMEM_CAP = _detect_vmem_capacity()
if _VMEM_CAP <= (64 << 20):          # v7x-class core: 64 MiB physical VMEM
    _VMEM_BUDGET = 44 << 20
    _VMEM_LIMIT = 52 << 20
    _TILE_TARGET = 256
else:                                # v5e / v6e: 128 MiB VMEM
    _VMEM_BUDGET = 96 << 20
    _VMEM_LIMIT = 112 << 20
    _TILE_TARGET = 512


def _vmem_estimate(tile, d_pad, hk, x_bytes, w_bytes, out_bytes):
    """Conservative VMEM working-set estimate (bytes) for one pipeline step."""
    weights = 2 * 2 * d_pad * hk * w_bytes        # W1 + W2 chunks, double-buffered
    biases = 2 * 2 * (hk + d_pad) * 4             # f32 bias blocks, double-buffered
    x_tiles = 2 * tile * d_pad * x_bytes          # x row-tile, double-buffered
    o_tiles = 2 * tile * d_pad * out_bytes        # out row-tile, double-buffered
    acc = tile * d_pad * 4                        # f32 accumulator scratch
    interm = tile * hk * (4 + w_bytes)            # ReLU activations headroom
    return weights + biases + x_tiles + o_tiles + acc + interm


def _adaptor_kernel(x_ref, w1_ref, b1_ref, w2_ref, b2_ref, o_ref, acc_ref):
    """out = x + relu(x @ W1 + b1) @ W2 + b2 for one row-tile, hidden-chunked.

    Grid = (row tiles, hidden chunks).  Both dots use bf16 operands on the MXU
    with f32 accumulation; biases are f32; the residual is added in the output
    dtype at the last hidden chunk.
    """
    j = pl.program_id(1)
    nj = pl.num_programs(1)

    @pl.when(j == 0)
    def _():
        acc_ref[...] = jnp.zeros_like(acc_ref)

    x = x_ref[...]                                     # (tile, D) input dtype
    xc = x.astype(w1_ref.dtype)                        # bf16 MXU operand
    h = jnp.maximum(
        jnp.dot(xc, w1_ref[...], preferred_element_type=jnp.float32)
        + b1_ref[...],                                 # (1, hk) f32
        0.0,
    )
    # TODO(synk): nn.Dropout(0.3) is identity in eval mode; training-mode
    # stochastic masking (pltpu.prng_random_bits) is not implemented here.
    acc_ref[...] += jnp.dot(h.astype(w2_ref.dtype), w2_ref[...],
                            preferred_element_type=jnp.float32)

    @pl.when(j == nj - 1)
    def _():
        o_ref[...] = (acc_ref[...] + b2_ref[...]).astype(o_ref.dtype) + x


@jax.jit
def semantic_offset_adaptor(x, w1, b1, w2, b2):
    """x: [..., D]; w1/w2 are (D, D) stored as (in_features, out_features)."""
    orig_shape = x.shape
    d = orig_shape[-1]
    x2d = x.reshape(-1, d)
    m = x2d.shape[0]

    # Lane-dense feature padding: multiple of 128 only (no 256 rounding).
    d_pad = _round_up(max(d, 128), 128)
    need_dpad = d_pad != d

    # bf16 MXU operands for the weights (halves residency); biases stay f32.
    def _to_compute(w):
        if jnp.issubdtype(w.dtype, jnp.floating) and jnp.dtype(w.dtype).itemsize > 2:
            return w.astype(jnp.bfloat16)
        return w

    w1c = _to_compute(w1)
    w2c = _to_compute(w2)

    x_bytes = jnp.dtype(x.dtype).itemsize
    w_bytes = jnp.dtype(w1c.dtype).itemsize
    out_bytes = x_bytes

    # Hidden-dim chunk: largest 128-multiple exact divisor of d_pad whose
    # double-buffered W1+W2 chunks fit in ~half the VMEM budget.
    hk = d_pad
    while hk > 128 and 4 * d_pad * hk * w_bytes > _VMEM_BUDGET // 2:
        nxt = None
        h = hk - 128
        while h >= 128:
            if d_pad % h == 0:
                nxt = h
                break
            h -= 128
        if nxt is None:
            break
        hk = nxt
    n_chunks = d_pad // hk

    # Row tile: multiple of the dtype's sublane packing, capped by the row
    # count and shrunk to fit the VMEM budget.
    sub = max(8, 32 // x_bytes)                  # f32: 8, bf16: 16, int8: 32
    tile = max(sub, min(_round_up(_TILE_TARGET, sub), _round_up(m, sub)))
    while tile > sub and _vmem_estimate(tile, d_pad, hk, x_bytes, w_bytes,
                                        out_bytes) > _VMEM_BUDGET:
        tile = max(sub, _round_up(tile // 2, sub))
    # Give v7x's two TensorCores at least 2 row-grid steps when rows permit.
    if pl.cdiv(m, tile) < 2 and tile > sub:
        tile = max(sub, _round_up(tile // 2, sub))

    grid_rows = pl.cdiv(m, tile)

    # Pad only the feature dim when it is not 128-aligned (rows use edge
    # masking via the cdiv grid, so no row pad / slice round trip).
    if need_dpad:
        x_p = jnp.pad(x2d, ((0, 0), (0, d_pad - d)))
        w1_p = jnp.pad(w1c, ((0, d_pad - d), (0, d_pad - d)))
        w2_p = jnp.pad(w2c, ((0, d_pad - d), (0, d_pad - d)))
    else:
        x_p, w1_p, w2_p = x2d, w1c, w2c
    b1_p = jnp.pad(b1.astype(jnp.float32), (0, d_pad - d)).reshape(1, d_pad)
    b2_p = jnp.pad(b2.astype(jnp.float32), (0, d_pad - d)).reshape(1, d_pad)

    out = pl.pallas_call(
        _adaptor_kernel,
        out_shape=jax.ShapeDtypeStruct((m, d_pad), x.dtype),
        grid_spec=pltpu.PrefetchScalarGridSpec(
            num_scalar_prefetch=0,
            grid=(grid_rows, n_chunks),
            in_specs=[
                pl.BlockSpec((tile, d_pad), lambda i, j: (i, 0)),   # x row-tile
                pl.BlockSpec((d_pad, hk), lambda i, j: (0, j)),     # W1 col-chunk
                pl.BlockSpec((1, hk), lambda i, j: (0, j)),         # b1 chunk (f32)
                pl.BlockSpec((hk, d_pad), lambda i, j: (j, 0)),     # W2 row-chunk
                pl.BlockSpec((1, d_pad), lambda i, j: (0, 0)),      # b2 (f32)
            ],
            out_specs=pl.BlockSpec((tile, d_pad), lambda i, j: (i, 0)),
            scratch_shapes=[pltpu.VMEM((tile, d_pad), jnp.float32)],
        ),
        compiler_params=pltpu.CompilerParams(
            dimension_semantics=("parallel", "arbitrary"),
            vmem_limit_bytes=_VMEM_LIMIT,
        ),
    )(x_p, w1_p, b1_p, w2_p, b2_p)

    if need_dpad:
        out = out[:, :d]
    return out.reshape(orig_shape)


def _init_params(key, embed_dim, dtype=jnp.float32):
    """Deterministic synthetic init (PyTorch-Linear-like uniform bounds)."""
    k1, k2, k3, k4 = jax.random.split(key, 4)
    bound = 1.0 / jnp.sqrt(embed_dim)
    # Stored as (in_features, out_features) == PyTorch weight transposed.
    w1 = jax.random.uniform(k1, (embed_dim, embed_dim), dtype, -bound, bound)
    b1 = jax.random.uniform(k2, (embed_dim,), dtype, -bound, bound)
    w2 = jax.random.uniform(k3, (embed_dim, embed_dim), dtype, -bound, bound)
    b2 = jax.random.uniform(k4, (embed_dim,), dtype, -bound, bound)
    return w1, b1, w2, b2


def _ref_f32(x, w1, b1, w2, b2):
    return x + jnp.maximum(x @ w1 + b1, 0.0) @ w2 + b2


def _ref_bf16(x, w1, b1, w2, b2):
    """Matches the kernel's precision: bf16 operands, f32 accumulation."""
    xb = x.astype(jnp.bfloat16)
    h = jnp.maximum(
        jnp.dot(xb, w1.astype(jnp.bfloat16), preferred_element_type=jnp.float32)
        + b1.astype(jnp.float32), 0.0)
    y = jnp.dot(h.astype(jnp.bfloat16), w2.astype(jnp.bfloat16),
                preferred_element_type=jnp.float32) + b2.astype(jnp.float32)
    return y.astype(x.dtype) + x


if __name__ == "__main__":
    key = jax.random.PRNGKey(0)
    kx, kp, kx2 = jax.random.split(key, 3)

    B, S, D = 2, 8, 32
    x = jax.random.normal(kx, (B, S, D), dtype=jnp.float32)
    w1, b1, w2, b2 = _init_params(kp, D)

    out = jax.block_until_ready(semantic_offset_adaptor(x, w1, b1, w2, b2))
    assert out.shape == x.shape
    # Loose check vs the pure-f32 math (bf16 MXU operands => ~1e-2 tolerances).
    assert jnp.allclose(out, _ref_f32(x, w1, b1, w2, b2), atol=5e-2, rtol=5e-2)
    # Tight check vs a precision-matched (bf16-operand, f32-accum) reference.
    assert jnp.allclose(out, _ref_bf16(x, w1, b1, w2, b2), atol=2e-3, rtol=2e-3)

    # Second shape: row count not a multiple of the tile -> exercises the
    # cdiv grid with a masked partial edge block (no row padding anywhere).
    x2 = jax.random.normal(kx2, (3, 7, D), dtype=jnp.float32)
    out2 = jax.block_until_ready(semantic_offset_adaptor(x2, w1, b1, w2, b2))
    assert out2.shape == x2.shape
    assert jnp.allclose(out2, _ref_f32(x2, w1, b1, w2, b2), atol=5e-2, rtol=5e-2)
    assert jnp.allclose(out2, _ref_bf16(x2, w1, b1, w2, b2), atol=2e-3, rtol=2e-3)

    print("KERNEL_OK")
</pallas_src>

<mosaic_0001>
module attributes {stable_mosaic.version = 11 : i64} {
  func.func @_adaptor_kernel(%arg0: i32, %arg1: i32, %arg2: memref<8x128xf32, #tpu.memory_space<vmem>>, %arg3: memref<128x128xbf16, #tpu.memory_space<vmem>>, %arg4: memref<1x128xf32, #tpu.memory_space<vmem>>, %arg5: memref<128x128xbf16, #tpu.memory_space<vmem>>, %arg6: memref<1x128xf32, #tpu.memory_space<vmem>>, %arg7: memref<8x128xf32, #tpu.memory_space<vmem>>, %arg8: memref<8x128xf32, #tpu.memory_space<vmem>>) attributes {dimension_semantics = [#tpu.dimension_semantics<parallel>, #tpu.dimension_semantics<arbitrary>], iteration_bounds = array<i64: 2, 1>, scalar_prefetch = 0 : i64, scratch_operands = 1 : i64, tpu.core_type = #tpu.core_type<tc>, window_params = [{transform_indices = @transform_0, window_bounds = array<i64: 8, 128>}, {transform_indices = @transform_1, window_bounds = array<i64: 128, 128>}, {transform_indices = @transform_2, window_bounds = array<i64: 1, 128>}, {transform_indices = @transform_3, window_bounds = array<i64: 128, 128>}, {pipeline_mode = #tpu.pipeline_mode<synchronous>, transform_indices = @transform_4, window_bounds = array<i64: 1, 128>}, {transform_indices = @transform_5, window_bounds = array<i64: 8, 128>}]} {
    %c0_i32 = arith.constant 0 : i32
    %0 = arith.cmpi eq, %arg1, %c0_i32 : i32
    %1 = arith.extui %0 : i1 to i32
    %c0_i32_0 = arith.constant 0 : i32
    %2 = arith.cmpi ne, %1, %c0_i32_0 : i32
    scf.if %2 {
      %cst_16 = arith.constant 0.000000e+00 : f32
      %21 = vector.broadcast %cst_16 : f32 to vector<8x128xf32>
      %c0_17 = arith.constant 0 : index
      %c0_18 = arith.constant 0 : index
      %22 = vector.load %arg8[%c0_17, %c0_18] : memref<8x128xf32, #tpu.memory_space<vmem>>, vector<8x128xf32>
      tpu.vector_store %arg8[%c0_17, %c0_18], %21 {strides = array<i32>} : memref<8x128xf32, #tpu.memory_space<vmem>>, vector<8x128xf32>,
    } else {
    }
    %c0 = arith.constant 0 : index
    %c0_1 = arith.constant 0 : index
    %3 = vector.load %arg2[%c0, %c0_1] : memref<8x128xf32, #tpu.memory_space<vmem>>, vector<8x128xf32>
    %4 = arith.truncf %3 : vector<8x128xf32> to vector<8x128xbf16>
    %c0_2 = arith.constant 0 : index
    %c0_3 = arith.constant 0 : index
    %5 = vector.load %arg3[%c0_2, %c0_3] : memref<128x128xbf16, #tpu.memory_space<vmem>>, vector<128x128xbf16>
    %cst = arith.constant dense<0.000000e+00> : vector<8x128xf32>
    %6 = tpu.matmul %4, %5, %cst {dimension_numbers = #tpu.dot_dimension_numbers<[1], [0], [0], [1], [0, 0, 1, 1], [], []>} : vector<8x128xbf16>, vector<128x128xbf16>, vector<8x128xf32> -> vector<8x128xf32>
    %c0_4 = arith.constant 0 : index
    %c0_5 = arith.constant 0 : index
    %7 = vector.load %arg4[%c0_4, %c0_5] : memref<1x128xf32, #tpu.memory_space<vmem>>, vector<1x128xf32>
    %8 = vector.broadcast %7 : vector<1x128xf32> to vector<8x128xf32>
    %9 = arith.addf %6, %8 : vector<8x128xf32>
    %cst_6 = arith.constant 0.000000e+00 : f32
    %10 = vector.broadcast %cst_6 : f32 to vector<8x128xf32>
    %11 = arith.maximumf %9, %10 : vector<8x128xf32>
    %c0_7 = arith.constant 0 : index
    %c0_8 = arith.constant 0 : index
    %12 = vector.load %arg8[%c0_7, %c0_8] : memref<8x128xf32, #tpu.memory_space<vmem>>, vector<8x128xf32>
    %13 = arith.truncf %11 : vector<8x128xf32> to vector<8x128xbf16>
    %c0_9 = arith.constant 0 : index
    %c0_10 = arith.constant 0 : index
    %14 = vector.load %arg5[%c0_9, %c0_10] : memref<128x128xbf16, #tpu.memory_space<vmem>>, vector<128x128xbf16>
    %cst_11 = arith.constant dense<0.000000e+00> : vector<8x128xf32>
    %15 = tpu.matmul %13, %14, %cst_11 {dimension_numbers = #tpu.dot_dimension_numbers<[1], [0], [0], [1], [0, 0, 1, 1], [], []>} : vector<8x128xbf16>, vector<128x128xbf16>, vector<8x128xf32> -> vector<8x128xf32>
    %16 = arith.addf %12, %15 : vector<8x128xf32>
    %c0_12 = arith.constant 0 : index
    %c0_13 = arith.constant 0 : index
    %17 = vector.load %arg8[%c0_12, %c0_13] : memref<8x128xf32, #tpu.memory_space<vmem>>, vector<8x128xf32>
    tpu.vector_store %arg8[%c0_12, %c0_13], %16 {strides = array<i32>} : memref<8x128xf32, #tpu.memory_space<vmem>>, vector<8x128xf32>,
    %c0_i32_14 = arith.constant 0 : i32
    %18 = arith.cmpi eq, %arg1, %c0_i32_14 : i32
    %19 = arith.extui %18 : i1 to i32
    %c0_i32_15 = arith.constant 0 : i32
    %20 = arith.cmpi ne, %19, %c0_i32_15 : i32
    scf.if %20 {
      %c0_16 = arith.constant 0 : index
      %c0_17 = arith.constant 0 : index
      %21 = vector.load %arg8[%c0_16, %c0_17] : memref<8x128xf32, #tpu.memory_space<vmem>>, vector<8x128xf32>
      %c0_18 = arith.constant 0 : index
      %c0_19 = arith.constant 0 : index
      %22 = vector.load %arg6[%c0_18, %c0_19] : memref<1x128xf32, #tpu.memory_space<vmem>>, vector<1x128xf32>
      %23 = vector.broadcast %22 : vector<1x128xf32> to vector<8x128xf32>
      %24 = arith.addf %21, %23 : vector<8x128xf32>
      %25 = arith.addf %24, %3 : vector<8x128xf32>
      %c0_20 = arith.constant 0 : index
      %c0_21 = arith.constant 0 : index
      %26 = vector.load %arg7[%c0_20, %c0_21] : memref<8x128xf32, #tpu.memory_space<vmem>>, vector<8x128xf32>
      tpu.vector_store %arg7[%c0_20, %c0_21], %25 {strides = array<i32>} : memref<8x128xf32, #tpu.memory_space<vmem>>, vector<8x128xf32>,
    } else {
    }
    return
  }
  func.func @transform_0(%arg0: i32, %arg1: i32) -> (i32, i32) {
    %c0_i32 = arith.constant 0 : i32
    %c0_i32_0 = arith.constant 0 : i32
    return %arg0, %c0_i32 : i32, i32
  }
  func.func @transform_1(%arg0: i32, %arg1: i32) -> (i32, i32) {
    %c0_i32 = arith.constant 0 : i32
    %c0_i32_0 = arith.constant 0 : i32
    return %c0_i32, %arg1 : i32, i32
  }
  func.func @transform_2(%arg0: i32, %arg1: i32) -> (i32, i32) {
    %c0_i32 = arith.constant 0 : i32
    %c0_i32_0 = arith.constant 0 : i32
    return %c0_i32, %arg1 : i32, i32
  }
  func.func @transform_3(%arg0: i32, %arg1: i32) -> (i32, i32) {
    %c0_i32 = arith.constant 0 : i32
    %c0_i32_0 = arith.constant 0 : i32
    return %arg1, %c0_i32 : i32, i32
  }
  func.func @transform_4(%arg0: i32, %arg1: i32) -> (i32, i32) {
    %c0_i32 = arith.constant 0 : i32
    %c0_i32_0 = arith.constant 0 : i32
    %c0_i32_1 = arith.constant 0 : i32
    return %c0_i32, %c0_i32_0 : i32, i32
  }
  func.func @transform_5(%arg0: i32, %arg1: i32) -> (i32, i32) {
    %c0_i32 = arith.constant 0 : i32
    %c0_i32_0 = arith.constant 0 : i32
    return %arg0, %c0_i32 : i32, i32
  }
}

</mosaic_0001>

<bundles_post_ra>
// kernel: semantic_offset_adaptor.1
= control target key start
LH: loop header
LB: loop body
LE: loop exit
PB: predicated region body
PF: predicated region fallthrough
CT: control target
= control target key end

     0   :  { %s817_s18 = smov 0   ;;  %s819_s19 = smov 0   ;;  %s915_s0 = inlined_call_operand.vmem [shape: f32[16,128], index: 0, kind: input, shape index: {}]   ;;  %s916_s1 = inlined_call_operand.vmem [shape: bf16[128,128], index: 1, kind: input, shape index: {}]   ;;  %s917_s2 = inlined_call_operand.vmem [shape: f32[1,128], index: 2, kind: input, shape index: {}]   ;;  %s918_s3 = inlined_call_operand.vmem [shape: bf16[128,128], index: 3, kind: input, shape index: {}]   ;;  %s919_s4 = inlined_call_operand.vmem [shape: f32[1,128], index: 4, kind: input, shape index: {}]   ;;  %s920_s5 = inlined_call_operand.vmem [shape: f32[16,128], index: 5, kind: output, shape index: {}]  }
   0x1   :  { %s821_s20 = smov 0  }
   0x2 LB: > { %s27_s21 = sadd.s32 1, %s779_s19  ;;  %p638_p0 = scmp.ge.s32.totalorder %s783_s20, 1  ;;  %s783_s20 = sphi %s821_s20, %s15_s20   ;;  %s779_s19 = sphi %s819_s19, %s922_s19   ;;  %s775_s18 = sphi %s817_s18, %s921_s18  }
   0x3   : > { %p29_p1 = scmp.ge.s32.totalorder %s27_s21, 2  ;;  %p226_p2 = scmp.lt.s32.totalorder %s783_s20, 3 }
   0x5   : > { %s924_s21 = smov (%p29_p1, %s27_s21), 0  ;;  %p227_p3 = pnand %p638_p0, %p226_p2 }
   0x6   : > { %v745_v0 = vld [vmem:[%s916_s1] sm:$0xff] (!%p227_p3)   ;;  %v785_v1 = vmov (!%p227_p3), 0.0   ;;  %v746_v2 = vld [vmem:[%s916_s1 + $0x8] sm:$0xff] (!%p227_p3)   ;;  %vm786_vm0 = vmmov (!%p227_p3), 0   ;;  %v747_v3 = vld [vmem:[%s916_s1 + $0x10] sm:$0xff] (!%p227_p3)   ;;  %p264_p4 = scmp.lt.s32.totalorder (!%p227_p3), %s775_s18, 1 }
   0x7   : > { %230 = sbr.rel (%p227_p3) target bundleno = 474 (0x1da), region = 40  ;;  %679 = vmatprep.subr.bf16.mxu0 (!%p227_p3), %v785_v1  ;;  %699 = vmatprep.subr.bf16.mxu1 (!%p227_p3), %v785_v1  ;;  %v753_v4 = vld [vmem:[%s918_s3] sm:$0xff] (!%p227_p3)   ;;  %v748_v5 = vld [vmem:[%s916_s1 + $0x18] sm:$0xff] (!%p227_p3)   ;;  %v754_v6 = vld [vmem:[%s918_s3 + $0x8] sm:$0xff] (!%p227_p3)  }
   0x8   : > { %680 = vmatpush3.bf16.msra.mxu0 (!%p227_p3), %v745_v0  ;;  %695 = vmatprep.mubr.msk.bf16.mxu0 (!%p227_p3), %vm786_vm0, %v785_v1  ;;  %v749_v7 = vld [vmem:[%s916_s1 + $0x20] sm:$0xff] (!%p227_p3)   ;;  %v755_v8 = vld [vmem:[%s918_s3 + $0x10] sm:$0xff] (!%p227_p3)   ;;  %v750_v9 = vld [vmem:[%s916_s1 + $0x28] sm:$0xff] (!%p227_p3)  }
   0x9   : > { %681 = vmatprep.subr.bf16.mxu0 (!%p227_p3), %v785_v1  ;;  %715 = vmatprep.mubr.msk.bf16.mxu1 (!%p227_p3), %vm786_vm0, %v785_v1  ;;  %v756_v10 = vld [vmem:[%s918_s3 + $0x18] sm:$0xff] (!%p227_p3)   ;;  %v751_v11 = vld [vmem:[%s916_s1 + $0x30] sm:$0xff] (!%p227_p3)   ;;  %v757_v12 = vld [vmem:[%s918_s3 + $0x20] sm:$0xff] (!%p227_p3)  }
   0xa   : > { %700 = vmatpush3.bf16.msra.mxu1 (!%p227_p3), %v753_v4  ;;  %v752_v13 = vld [vmem:[%s916_s1 + $0x38] sm:$0xff] (!%p227_p3)   ;;  %v758_v15 = vld [vmem:[%s918_s3 + $0x28] sm:$0xff] (!%p227_p3)   ;;  %v759_v17 = vld [vmem:[%s918_s3 + $0x30] sm:$0xff] (!%p227_p3)  }
   0xb   : > { %701 = vmatprep.subr.bf16.mxu1 (!%p227_p3), %v785_v1  ;;  %v760_v18 = vld [vmem:[%s918_s3 + $0x38] sm:$0xff] (!%p227_p3)   ;;  %v641_v19 = vld [vmem:[%s917_s2] ss:$0 sm:$0xff] (!%p227_p3) }
   0xc   : > { %682 = vmatpush3.bf16.msra.mxu0 (!%p227_p3), %v746_v2  ;;  %v658_v27 = vld [vmem:[%s919_s4] ss:$0 sm:$0xff] (!%p227_p3) }
   0xd   : > { %683 = vmatprep.subr.bf16.mxu0 (!%p227_p3), %v785_v1 }
   0xe   : > { %702 = vmatpush3.bf16.msra.mxu1 %v754_v6  ;;  %s926_s18 = smov (!%p264_p4, %s775_s18), 1 }
   0xf   : > { %703 = vmatprep.subr.bf16.mxu1 %v785_v1  ;;  %s639_s17 = sshll.u32 %s926_s18, 3 }
  0x10   : > { %684 = vmatpush3.bf16.msra.mxu0 %v747_v3  ;;  %s267_s26 = scalar_lea.vmem %s915_s0, %s639_s17  ;;  %s284_s23 = scalar_lea.vmem %s920_s5, %s639_s17 }
  0x11   : > { %685 = vmatprep.subr.bf16.mxu0 %v785_v1  ;;  %v291_v14 = vld [vmem:[%s267_s26] sm:$0xff] }
  0x12   : > { %704 = vmatpush3.bf16.msra.mxu1 %v755_v8  ;;  %v292_v16 = vpack.c.bf16 %v291_v14, %v291_v14 }
  0x13   : > { %705 = vmatprep.subr.bf16.mxu1 %v785_v1 }
  0x14   : > { %686 = vmatpush3.bf16.msra.mxu0 %v748_v5 }
  0x15   : > { %687 = vmatprep.subr.bf16.mxu0 %v785_v1 }
  0x16   : > { %706 = vmatpush3.bf16.msra.mxu1 %v756_v10 }
  0x17   : > { %707 = vmatprep.subr.bf16.mxu1 %v785_v1 }
  0x18   : > { %688 = vmatpush3.bf16.msra.mxu0 %v749_v7 }
  0x19   : > { %689 = vmatprep.subr.bf16.mxu0 %v785_v1 }
  0x1a   : > { %708 = vmatpush3.bf16.msra.mxu1 %v757_v12 }
  0x1b   : > { %709 = vmatprep.subr.bf16.mxu1 %v785_v1 }
  0x1c   : > { %690 = vmatpush3.bf16.msra.mxu0 %v750_v9 }
  0x1d   : > { %691 = vmatprep.subr.bf16.mxu0 %v785_v1 }
  0x1e   : > { %710 = vmatpush3.bf16.msra.mxu1 %v758_v15 }
  0x1f   : > { %711 = vmatprep.subr.bf16.mxu1 %v785_v1 }
  0x20   : > { %692 = vmatpush3.bf16.msra.mxu0 %v751_v11 }
  0x21   : > { %693 = vmatprep.subr.bf16.mxu0 %v785_v1 }
  0x22   : > { %712 = vmatpush3.bf16.msra.mxu1 %v759_v17 }
  0x23   : > { %713 = vmatprep.subr.bf16.mxu1 %v785_v1 }
  0x24   : > { %694 = vmatpush3.bf16.msra.mxu0 %v752_v13 }
  0x26   : > { %714 = vmatpush3.bf16.msra.mxu1 %v760_v18 }
  0x27   : > { %696 = vmatmul.mubr.bf16.vlgmr.msra.gmra.mrb[0].mxu0 %v292_v16 }
  0xfa   : > { %v398_v20 = vpop.f32.mrb[0].mxu0 }
  0xfb   : > { %v399_v21 = vadd.f32 %v641_v19, %v398_v20  ;;  %v697_v22 = vpop.f32.mrb[1].mxu0 }
  0xfc   : > { %v401_v23 = vpop.f32.mrb[2].mxu0 }
  0xfd   : > { %v404_v24 = vmax.f32 %v399_v21, 0.0  ;;  %v698_v25 = vpop.f32.mrb[3].mxu0 }
  0xff   : > { %v406_v26 = vpack.c.bf16 %v404_v24, %v404_v24 }
 0x101   : > { %716 = vmatmul.mubr.bf16.vlgmr.msra.gmra.mrb[0].mxu1 %v406_v26 }
 0x1d4   : > { %v505_v28 = vpop.f32.mrb[0].mxu1 }
 0x1d5   : > { %v524_v29 = vadd.f32 %v658_v27, %v505_v28  ;;  %v717_v30 = vpop.f32.mrb[1].mxu1 }
 0x1d6   : > { %v508_v31 = vpop.f32.mrb[2].mxu1 }
 0x1d7   : > { %v525_v32 = vadd.f32 %v524_v29, %v291_v14  ;;  %v718_v33 = vpop.f32.mrb[3].mxu1 }
 0x1d9   : > { %526 = vst [vmem:[%s284_s23] sm:$0xff] %v525_v32 }
 0x1da PF: > { %s15_s20 = sadd.s32 1, %s783_s20   ;;  %s921_s18 = smov %s779_s19 }
 0x1db   : > { %p12_p5 = scmp.ge.s32.totalorder %s15_s20, 4   ;;  %s922_s19 = smov %s924_s21 }
 0x1dd   :  { %14 = sbr.rel (!%p12_p5) target bundleno = 2 (0x2), region = 87 }

</bundles_post_ra>
